<compile_context>
chip_gen: v7x
topology: tpu7x:2x2x1
jax: 0.10.0
libtpu: 0.0.40
codegen_flags: <defaults>
</compile_context>

<pallas_src>
import functools

import jax
import jax.numpy as jnp
from jax.experimental import pallas as pl
from jax.experimental.pallas import tpu as pltpu

_LN_EPS = 1e-5  # PyTorch nn.LayerNorm default eps


def actor_kernel(
    state_ref,
    w1_ref, b1_ref, g1_ref, be1_ref,      # layer 1 (lane-padded to H1P)
    wh_ref, bh_ref, gh_ref, beh_ref,      # fused heads [Wd | Wc] (lane-padded to HP)
    out_ref,                              # (B, HP) lane-dense output slab
    *, h1, num_d, num_c,
):
    B = state_ref.shape[0]
    H1P = w1_ref.shape[1]
    HP = wh_ref.shape[1]

    x = state_ref[...]                                               # (B, S)

    # ---------------- layer 1: Linear -> LayerNorm -> ReLU ----------------
    h = jnp.dot(x, w1_ref[...], preferred_element_type=jnp.float32) + b1_ref[...]
    lane1 = jax.lax.broadcasted_iota(jnp.int32, (B, H1P), 1)
    m1 = lane1 < h1                                                  # true H1 lanes
    mean1 = jnp.sum(jnp.where(m1, h, 0.0), axis=-1, keepdims=True) * (1.0 / h1)
    d1 = jnp.where(m1, h - mean1, 0.0)
    var1 = jnp.sum(d1 * d1, axis=-1, keepdims=True) * (1.0 / h1)
    hn = d1 * jax.lax.rsqrt(var1 + _LN_EPS) * g1_ref[...] + be1_ref[...]
    a = jnp.where(m1, jnp.maximum(hn, 0.0), 0.0)                     # zeros in padded lanes

    # ------------- fused heads: a single MXU push for [Wd | Wc] -------------
    z = jnp.dot(a, wh_ref[...], preferred_element_type=jnp.float32) + bh_ref[...]
    laneh = jax.lax.broadcasted_iota(jnp.int32, (B, HP), 1)
    md = laneh < num_d                                               # discrete lanes
    mc = (laneh >= num_d) & (laneh < num_d + num_c)                  # continuous lanes
    gh = gh_ref[...]
    beh = beh_ref[...]

    # discrete head: LayerNorm over the true D lanes -> softmax
    mean_d = jnp.sum(jnp.where(md, z, 0.0), axis=-1, keepdims=True) * (1.0 / num_d)
    dd = jnp.where(md, z - mean_d, 0.0)
    var_d = jnp.sum(dd * dd, axis=-1, keepdims=True) * (1.0 / num_d)
    dn = dd * jax.lax.rsqrt(var_d + _LN_EPS) * gh + beh
    mx = jnp.max(jnp.where(md, dn, -jnp.inf), axis=-1, keepdims=True)
    e = jnp.where(md, jnp.exp(dn - mx), 0.0)
    denom = jnp.sum(e, axis=-1, keepdims=True)
    disc = e * pl.reciprocal(denom, approx=True)                     # EUP vrcp, ~free

    # continuous head: LayerNorm over the true C lanes -> tanh
    mean_c = jnp.sum(jnp.where(mc, z, 0.0), axis=-1, keepdims=True) * (1.0 / num_c)
    dc = jnp.where(mc, z - mean_c, 0.0)
    var_c = jnp.sum(dc * dc, axis=-1, keepdims=True) * (1.0 / num_c)
    cn = dc * jax.lax.rsqrt(var_c + _LN_EPS) * gh + beh
    cont = jnp.where(mc, jnp.tanh(cn), 0.0)

    # masks are disjoint -> one lane-dense unmasked store
    out_ref[...] = (disc + cont).astype(out_ref.dtype)


def _round_up(n, m):
    return ((n + m - 1) // m) * m


def _pad_lanes(x, width, fill=0.0):
    return jnp.pad(x, ((0, 0), (0, width - x.shape[-1])), constant_values=fill)


def make_params(key, state_dim, hidden1, num_discrete, num_continuous):
    """Logical (unpadded) params mirroring the PyTorch init:
       Linear weight/bias ~ N(0, 0.1); LayerNorm gamma=1, beta=0.
       Linear weights stored pre-transposed as (in, out)."""
    # TODO(synk): l2/ln2 from __init__ are unused in forward(), so not materialized.
    ks = jax.random.split(key, 6)
    n = lambda k, shape: (0.1 * jax.random.normal(k, shape)).astype(jnp.float32)
    return {
        "w1": n(ks[0], (state_dim, hidden1)),
        "b1": n(ks[1], (1, hidden1)),
        "g1": jnp.ones((1, hidden1), jnp.float32),
        "be1": jnp.zeros((1, hidden1), jnp.float32),
        "wd": n(ks[2], (hidden1, num_discrete)),
        "bd": n(ks[3], (1, num_discrete)),
        "gd": jnp.ones((1, num_discrete), jnp.float32),
        "bed": jnp.zeros((1, num_discrete), jnp.float32),
        "wc": n(ks[4], (hidden1, num_continuous)),
        "bc": n(ks[5], (1, num_continuous)),
        "gc": jnp.ones((1, num_continuous), jnp.float32),
        "bec": jnp.zeros((1, num_continuous), jnp.float32),
    }


def pack_params(p, hidden1, num_discrete, num_continuous):
    """Pad lane dims to 128 and fuse the two heads' weights/LN params so the
       kernel sees lane-dense tiles and a single head matmul."""
    h1p = _round_up(hidden1, 128)
    hp = _round_up(num_discrete + num_continuous, 128)

    wh = jnp.concatenate([p["wd"], p["wc"]], axis=1)          # (H1, D+C)
    wh = _pad_lanes(wh, hp)
    wh = jnp.pad(wh, ((0, h1p - hidden1), (0, 0)))            # zero rows for padded H1

    return {
        "w1": _pad_lanes(p["w1"], h1p),
        "b1": _pad_lanes(p["b1"], h1p),
        "g1": _pad_lanes(p["g1"], h1p, 1.0),
        "be1": _pad_lanes(p["be1"], h1p),
        "wh": wh,
        "bh": _pad_lanes(jnp.concatenate([p["bd"], p["bc"]], axis=1), hp),
        "gh": _pad_lanes(jnp.concatenate([p["gd"], p["gc"]], axis=1), hp, 1.0),
        "beh": _pad_lanes(jnp.concatenate([p["bed"], p["bec"]], axis=1), hp),
    }


def actor_forward(state, packed, *, hidden1, num_discrete, num_continuous):
    """state: (B, state_dim) f32.  packed: output of pack_params."""
    B = state.shape[0]
    HP = packed["wh"].shape[1]
    kernel = functools.partial(
        actor_kernel, h1=hidden1, num_d=num_discrete, num_c=num_continuous)
    vmem = pl.BlockSpec(memory_space=pltpu.MemorySpace.VMEM)
    out = pl.pallas_call(
        kernel,
        out_shape=jax.ShapeDtypeStruct((B, HP), jnp.float32),
        in_specs=[vmem] * 9,
        out_specs=vmem,
    )(
        state,
        packed["w1"], packed["b1"], packed["g1"], packed["be1"],
        packed["wh"], packed["bh"], packed["gh"], packed["beh"],
    )
    # lane-dense slab -> the two logical outputs (sliced outside the kernel)
    disc = out[:, :num_discrete]
    cont = out[:, num_discrete:num_discrete + num_continuous]
    return disc, cont


def _reference(state, p):
    def ln(x, g, b):
        m = jnp.mean(x, -1, keepdims=True)
        v = jnp.mean((x - m) ** 2, -1, keepdims=True)
        return (x - m) / jnp.sqrt(v + _LN_EPS) * g + b
    a = jax.nn.relu(ln(state @ p["w1"] + p["b1"], p["g1"], p["be1"]))
    d = jax.nn.softmax(ln(a @ p["wd"] + p["bd"], p["gd"], p["bed"]), axis=-1)
    c = jnp.tanh(ln(a @ p["wc"] + p["bc"], p["gc"], p["bec"]))
    return d, c


if __name__ == "__main__":
    # Small shapes consistent with the module (hidden_sizes scaled down).
    B, STATE_DIM, H1 = 8, 32, 64
    NUM_DISCRETE, NUM_CONTINUOUS = 16, 8

    key = jax.random.PRNGKey(0)
    k_state, k_params = jax.random.split(key)
    state = jax.random.normal(k_state, (B, STATE_DIM), dtype=jnp.float32)
    params = make_params(k_params, STATE_DIM, H1, NUM_DISCRETE, NUM_CONTINUOUS)
    packed = pack_params(params, H1, NUM_DISCRETE, NUM_CONTINUOUS)

    disc, cont = actor_forward(
        state, packed,
        hidden1=H1, num_discrete=NUM_DISCRETE, num_continuous=NUM_CONTINUOUS)
    jax.block_until_ready((disc, cont))

    ref_d, ref_c = _reference(state, params)
    # Discrete head uses the EUP approx reciprocal for the softmax denominator;
    # allow a slightly looser (still tiny on a probability scale) tolerance.
    assert jnp.allclose(disc, ref_d, atol=2e-3, rtol=2e-3), "discrete head mismatch"
    assert jnp.allclose(cont, ref_c, atol=1e-5, rtol=1e-5), "continuous head mismatch"
    assert disc.shape == (B, NUM_DISCRETE) and cont.shape == (B, NUM_CONTINUOUS)

    print("KERNEL_OK")
</pallas_src>

<mosaic_0001>
module attributes {stable_mosaic.version = 11 : i64} {
  func.func @actor_kernel(%arg0: memref<8x32xf32, #tpu.memory_space<vmem>>, %arg1: memref<32x128xf32, #tpu.memory_space<vmem>>, %arg2: memref<1x128xf32, #tpu.memory_space<vmem>>, %arg3: memref<1x128xf32, #tpu.memory_space<vmem>>, %arg4: memref<1x128xf32, #tpu.memory_space<vmem>>, %arg5: memref<128x128xf32, #tpu.memory_space<vmem>>, %arg6: memref<1x128xf32, #tpu.memory_space<vmem>>, %arg7: memref<1x128xf32, #tpu.memory_space<vmem>>, %arg8: memref<1x128xf32, #tpu.memory_space<vmem>>, %arg9: memref<8x128xf32, #tpu.memory_space<vmem>>) attributes {dimension_semantics = [], scalar_prefetch = 0 : i64, scratch_operands = 0 : i64, tpu.core_type = #tpu.core_type<tc>} {
    %c0 = arith.constant 0 : index
    %c0_0 = arith.constant 0 : index
    %0 = vector.load %arg0[%c0, %c0_0] : memref<8x32xf32, #tpu.memory_space<vmem>>, vector<8x32xf32>
    %c0_1 = arith.constant 0 : index
    %c0_2 = arith.constant 0 : index
    %1 = vector.load %arg1[%c0_1, %c0_2] : memref<32x128xf32, #tpu.memory_space<vmem>>, vector<32x128xf32>
    %cst = arith.constant dense<0.000000e+00> : vector<8x128xf32>
    %2 = tpu.matmul %0, %1, %cst {dimension_numbers = #tpu.dot_dimension_numbers<[1], [0], [0], [1], [0, 0, 1, 1], [], []>} : vector<8x32xf32>, vector<32x128xf32>, vector<8x128xf32> -> vector<8x128xf32>
    %c0_3 = arith.constant 0 : index
    %c0_4 = arith.constant 0 : index
    %3 = vector.load %arg2[%c0_3, %c0_4] : memref<1x128xf32, #tpu.memory_space<vmem>>, vector<1x128xf32>
    %4 = vector.broadcast %3 : vector<1x128xf32> to vector<8x128xf32>
    %5 = arith.addf %2, %4 : vector<8x128xf32>
    %6 = tpu.iota {dimensions = array<i32: 1>} : vector<8x128xi32>
    %c64_i32 = arith.constant 64 : i32
    %7 = vector.broadcast %c64_i32 : i32 to vector<8x128xi32>
    %8 = arith.cmpi slt, %6, %7 : vector<8x128xi32>
    %cst_5 = arith.constant 0.000000e+00 : f32
    %9 = vector.broadcast %cst_5 : f32 to vector<8x128xf32>
    %10 = arith.select %8, %5, %9 : vector<8x128xi1>, vector<8x128xf32>
    %cst_6 = arith.constant dense<0.000000e+00> : vector<8xf32>
    %11 = vector.multi_reduction <add>, %10, %cst_6 [1] : vector<8x128xf32> to vector<8xf32>
    %12 = vector.shape_cast %11 : vector<8xf32> to vector<8x1xf32>
    %cst_7 = arith.constant 1.562500e-02 : f32
    %13 = vector.broadcast %cst_7 : f32 to vector<8x1xf32>
    %14 = arith.mulf %12, %13 : vector<8x1xf32>
    %15 = vector.broadcast %14 : vector<8x1xf32> to vector<8x128xf32>
    %16 = arith.subf %5, %15 : vector<8x128xf32>
    %cst_8 = arith.constant 0.000000e+00 : f32
    %17 = vector.broadcast %cst_8 : f32 to vector<8x128xf32>
    %18 = arith.select %8, %16, %17 : vector<8x128xi1>, vector<8x128xf32>
    %19 = arith.mulf %18, %18 : vector<8x128xf32>
    %cst_9 = arith.constant dense<0.000000e+00> : vector<8xf32>
    %20 = vector.multi_reduction <add>, %19, %cst_9 [1] : vector<8x128xf32> to vector<8xf32>
    %21 = vector.shape_cast %20 : vector<8xf32> to vector<8x1xf32>
    %cst_10 = arith.constant 1.562500e-02 : f32
    %22 = vector.broadcast %cst_10 : f32 to vector<8x1xf32>
    %23 = arith.mulf %21, %22 : vector<8x1xf32>
    %cst_11 = arith.constant 9.99999974E-6 : f32
    %24 = vector.broadcast %cst_11 : f32 to vector<8x1xf32>
    %25 = arith.addf %23, %24 : vector<8x1xf32>
    %26 = math.rsqrt %25 : vector<8x1xf32>
    %27 = vector.broadcast %26 : vector<8x1xf32> to vector<8x128xf32>
    %28 = arith.mulf %18, %27 : vector<8x128xf32>
    %c0_12 = arith.constant 0 : index
    %c0_13 = arith.constant 0 : index
    %29 = vector.load %arg3[%c0_12, %c0_13] : memref<1x128xf32, #tpu.memory_space<vmem>>, vector<1x128xf32>
    %30 = vector.broadcast %29 : vector<1x128xf32> to vector<8x128xf32>
    %31 = arith.mulf %28, %30 : vector<8x128xf32>
    %c0_14 = arith.constant 0 : index
    %c0_15 = arith.constant 0 : index
    %32 = vector.load %arg4[%c0_14, %c0_15] : memref<1x128xf32, #tpu.memory_space<vmem>>, vector<1x128xf32>
    %33 = vector.broadcast %32 : vector<1x128xf32> to vector<8x128xf32>
    %34 = arith.addf %31, %33 : vector<8x128xf32>
    %cst_16 = arith.constant 0.000000e+00 : f32
    %35 = vector.broadcast %cst_16 : f32 to vector<8x128xf32>
    %36 = arith.maximumf %34, %35 : vector<8x128xf32>
    %cst_17 = arith.constant 0.000000e+00 : f32
    %37 = vector.broadcast %cst_17 : f32 to vector<8x128xf32>
    %38 = arith.select %8, %36, %37 : vector<8x128xi1>, vector<8x128xf32>
    %c0_18 = arith.constant 0 : index
    %c0_19 = arith.constant 0 : index
    %39 = vector.load %arg5[%c0_18, %c0_19] : memref<128x128xf32, #tpu.memory_space<vmem>>, vector<128x128xf32>
    %cst_20 = arith.constant dense<0.000000e+00> : vector<8x128xf32>
    %40 = tpu.matmul %38, %39, %cst_20 {dimension_numbers = #tpu.dot_dimension_numbers<[1], [0], [0], [1], [0, 0, 1, 1], [], []>} : vector<8x128xf32>, vector<128x128xf32>, vector<8x128xf32> -> vector<8x128xf32>
    %c0_21 = arith.constant 0 : index
    %c0_22 = arith.constant 0 : index
    %41 = vector.load %arg6[%c0_21, %c0_22] : memref<1x128xf32, #tpu.memory_space<vmem>>, vector<1x128xf32>
    %42 = vector.broadcast %41 : vector<1x128xf32> to vector<8x128xf32>
    %43 = arith.addf %40, %42 : vector<8x128xf32>
    %44 = tpu.iota {dimensions = array<i32: 1>} : vector<8x128xi32>
    %c16_i32 = arith.constant 16 : i32
    %45 = vector.broadcast %c16_i32 : i32 to vector<8x128xi32>
    %46 = arith.cmpi slt, %44, %45 : vector<8x128xi32>
    %c16_i32_23 = arith.constant 16 : i32
    %47 = vector.broadcast %c16_i32_23 : i32 to vector<8x128xi32>
    %48 = arith.cmpi sge, %44, %47 : vector<8x128xi32>
    %c24_i32 = arith.constant 24 : i32
    %49 = vector.broadcast %c24_i32 : i32 to vector<8x128xi32>
    %50 = arith.cmpi slt, %44, %49 : vector<8x128xi32>
    %51 = arith.andi %48, %50 : vector<8x128xi1>
    %c0_24 = arith.constant 0 : index
    %c0_25 = arith.constant 0 : index
    %52 = vector.load %arg7[%c0_24, %c0_25] : memref<1x128xf32, #tpu.memory_space<vmem>>, vector<1x128xf32>
    %c0_26 = arith.constant 0 : index
    %c0_27 = arith.constant 0 : index
    %53 = vector.load %arg8[%c0_26, %c0_27] : memref<1x128xf32, #tpu.memory_space<vmem>>, vector<1x128xf32>
    %cst_28 = arith.constant 0.000000e+00 : f32
    %54 = vector.broadcast %cst_28 : f32 to vector<8x128xf32>
    %55 = arith.select %46, %43, %54 : vector<8x128xi1>, vector<8x128xf32>
    %cst_29 = arith.constant dense<0.000000e+00> : vector<8xf32>
    %56 = vector.multi_reduction <add>, %55, %cst_29 [1] : vector<8x128xf32> to vector<8xf32>
    %57 = vector.shape_cast %56 : vector<8xf32> to vector<8x1xf32>
    %cst_30 = arith.constant 6.250000e-02 : f32
    %58 = vector.broadcast %cst_30 : f32 to vector<8x1xf32>
    %59 = arith.mulf %57, %58 : vector<8x1xf32>
    %60 = vector.broadcast %59 : vector<8x1xf32> to vector<8x128xf32>
    %61 = arith.subf %43, %60 : vector<8x128xf32>
    %cst_31 = arith.constant 0.000000e+00 : f32
    %62 = vector.broadcast %cst_31 : f32 to vector<8x128xf32>
    %63 = arith.select %46, %61, %62 : vector<8x128xi1>, vector<8x128xf32>
    %64 = arith.mulf %63, %63 : vector<8x128xf32>
    %cst_32 = arith.constant dense<0.000000e+00> : vector<8xf32>
    %65 = vector.multi_reduction <add>, %64, %cst_32 [1] : vector<8x128xf32> to vector<8xf32>
    %66 = vector.shape_cast %65 : vector<8xf32> to vector<8x1xf32>
    %cst_33 = arith.constant 6.250000e-02 : f32
    %67 = vector.broadcast %cst_33 : f32 to vector<8x1xf32>
    %68 = arith.mulf %66, %67 : vector<8x1xf32>
    %cst_34 = arith.constant 9.99999974E-6 : f32
    %69 = vector.broadcast %cst_34 : f32 to vector<8x1xf32>
    %70 = arith.addf %68, %69 : vector<8x1xf32>
    %71 = math.rsqrt %70 : vector<8x1xf32>
    %72 = vector.broadcast %71 : vector<8x1xf32> to vector<8x128xf32>
    %73 = arith.mulf %63, %72 : vector<8x128xf32>
    %74 = vector.broadcast %52 : vector<1x128xf32> to vector<8x128xf32>
    %75 = arith.mulf %73, %74 : vector<8x128xf32>
    %76 = vector.broadcast %53 : vector<1x128xf32> to vector<8x128xf32>
    %77 = arith.addf %75, %76 : vector<8x128xf32>
    %cst_35 = arith.constant 0xFF800000 : f32
    %78 = vector.broadcast %cst_35 : f32 to vector<8x128xf32>
    %79 = arith.select %46, %77, %78 : vector<8x128xi1>, vector<8x128xf32>
    %cst_36 = arith.constant dense<0xFF800000> : vector<8xf32>
    %80 = vector.multi_reduction <maximumf>, %79, %cst_36 [1] : vector<8x128xf32> to vector<8xf32>
    %81 = vector.shape_cast %80 : vector<8xf32> to vector<8x1xf32>
    %82 = vector.broadcast %81 : vector<8x1xf32> to vector<8x128xf32>
    %83 = arith.subf %77, %82 : vector<8x128xf32>
    %84 = math.exp %83 : vector<8x128xf32>
    %cst_37 = arith.constant 0.000000e+00 : f32
    %85 = vector.broadcast %cst_37 : f32 to vector<8x128xf32>
    %86 = arith.select %46, %84, %85 : vector<8x128xi1>, vector<8x128xf32>
    %cst_38 = arith.constant dense<0.000000e+00> : vector<8xf32>
    %87 = vector.multi_reduction <add>, %86, %cst_38 [1] : vector<8x128xf32> to vector<8xf32>
    %88 = vector.shape_cast %87 : vector<8xf32> to vector<8x1xf32>
    %89 = tpu.reciprocal %88 {approx = true} : vector<8x1xf32> -> vector<8x1xf32>
    %90 = vector.broadcast %89 : vector<8x1xf32> to vector<8x128xf32>
    %91 = arith.mulf %86, %90 : vector<8x128xf32>
    %cst_39 = arith.constant 0.000000e+00 : f32
    %92 = vector.broadcast %cst_39 : f32 to vector<8x128xf32>
    %93 = arith.select %51, %43, %92 : vector<8x128xi1>, vector<8x128xf32>
    %cst_40 = arith.constant dense<0.000000e+00> : vector<8xf32>
    %94 = vector.multi_reduction <add>, %93, %cst_40 [1] : vector<8x128xf32> to vector<8xf32>
    %95 = vector.shape_cast %94 : vector<8xf32> to vector<8x1xf32>
    %cst_41 = arith.constant 1.250000e-01 : f32
    %96 = vector.broadcast %cst_41 : f32 to vector<8x1xf32>
    %97 = arith.mulf %95, %96 : vector<8x1xf32>
    %98 = vector.broadcast %97 : vector<8x1xf32> to vector<8x128xf32>
    %99 = arith.subf %43, %98 : vector<8x128xf32>
    %cst_42 = arith.constant 0.000000e+00 : f32
    %100 = vector.broadcast %cst_42 : f32 to vector<8x128xf32>
    %101 = arith.select %51, %99, %100 : vector<8x128xi1>, vector<8x128xf32>
    %102 = arith.mulf %101, %101 : vector<8x128xf32>
    %cst_43 = arith.constant dense<0.000000e+00> : vector<8xf32>
    %103 = vector.multi_reduction <add>, %102, %cst_43 [1] : vector<8x128xf32> to vector<8xf32>
    %104 = vector.shape_cast %103 : vector<8xf32> to vector<8x1xf32>
    %cst_44 = arith.constant 1.250000e-01 : f32
    %105 = vector.broadcast %cst_44 : f32 to vector<8x1xf32>
    %106 = arith.mulf %104, %105 : vector<8x1xf32>
    %cst_45 = arith.constant 9.99999974E-6 : f32
    %107 = vector.broadcast %cst_45 : f32 to vector<8x1xf32>
    %108 = arith.addf %106, %107 : vector<8x1xf32>
    %109 = math.rsqrt %108 : vector<8x1xf32>
    %110 = vector.broadcast %109 : vector<8x1xf32> to vector<8x128xf32>
    %111 = arith.mulf %101, %110 : vector<8x128xf32>
    %112 = vector.broadcast %52 : vector<1x128xf32> to vector<8x128xf32>
    %113 = arith.mulf %111, %112 : vector<8x128xf32>
    %114 = vector.broadcast %53 : vector<1x128xf32> to vector<8x128xf32>
    %115 = arith.addf %113, %114 : vector<8x128xf32>
    %116 = math.tanh %115 : vector<8x128xf32>
    %cst_46 = arith.constant 0.000000e+00 : f32
    %117 = vector.broadcast %cst_46 : f32 to vector<8x128xf32>
    %118 = arith.select %51, %116, %117 : vector<8x128xi1>, vector<8x128xf32>
    %119 = arith.addf %91, %118 : vector<8x128xf32>
    %c0_47 = arith.constant 0 : index
    %c0_48 = arith.constant 0 : index
    %120 = vector.load %arg9[%c0_47, %c0_48] : memref<8x128xf32, #tpu.memory_space<vmem>>, vector<8x128xf32>
    tpu.vector_store %arg9[%c0_47, %c0_48], %119 {strides = array<i32>} : memref<8x128xf32, #tpu.memory_space<vmem>>, vector<8x128xf32>,
    return
  }
}

</mosaic_0001>

<bundles_post_ra>
// kernel: tpu_custom_call.1
= control target key start
LH: loop header
LB: loop body
LE: loop exit
PB: predicated region body
PF: predicated region fallthrough
CT: control target
= control target key end

     0   :  { %14 = vsyncpa [#allocation3], 0  ;;  %s756_s0 = inlined_call_operand.hbm [shape: f32[8,32], index: 0, kind: input, shape index: {}]   ;;  %s757_s1 = inlined_call_operand.hbm [shape: f32[32,128], index: 1, kind: input, shape index: {}]   ;;  %s758_s2 = inlined_call_operand.vmem [shape: f32[1,128], index: 2, kind: input, shape index: {}]   ;;  %s759_s3 = inlined_call_operand.vmem [shape: f32[1,128], index: 3, kind: input, shape index: {}]   ;;  %s760_s4 = inlined_call_operand.vmem [shape: f32[1,128], index: 4, kind: input, shape index: {}]   ;;  %s761_s5 = inlined_call_operand.hbm [shape: f32[128,128], index: 5, kind: input, shape index: {}]   ;;  %s762_s6 = inlined_call_operand.vmem [shape: f32[1,128], index: 6, kind: input, shape index: {}]   ;;  %s763_s7 = inlined_call_operand.vmem [shape: f32[1,128], index: 7, kind: input, shape index: {}]   ;;  %s764_s8 = inlined_call_operand.vmem [shape: f32[1,128], index: 8, kind: input, shape index: {}]   ;;  %s765_s9 = inlined_call_operand.hbm [shape: f32[8,128], index: 9, kind: output, shape index: {}]  }
   0x1   :  { %15 = vsyncpa [#allocation6], 0 }
   0x2   :  { %16 = vsyncpa [#allocation4], 0  ;;  %s585_s30 = smov [#allocation5]   ;;  %s491_s13 = scalar_lea.hbm %s757_s1, 512 }
   0x3   :  { %s32_s10 = sshll.u32 %s585_s30, 4  ;;  %p492_p0 = scmp.ne.s32.totalorder %s757_s1, %s491_s13  ;;  %s33_s10 = int_to_ptr.vmem [resolvable:$true] %s32_s10 }
   0x4   :  { %p495_p1 = scmp.lt.u32.totalorder %s491_s13, %s757_s1 }
   0x6   :  { %p497_p2 = pnand %p495_p1, %p492_p0 }
   0x8   :  { %500 = shalt.err (!%p497_p2)
}
   0x9   :  { %s501_s18 = scalar_lea.vmem %s33_s10, 512  ;;  %p506_p4 = scmp.lt.s32.totalorder %s33_s10, %s33_s10 }
   0xa   :  { %p502_p3 = scmp.ne.s32.totalorder %s33_s10, %s501_s18  ;;  %p507_p5 = scmp.lt.s32.totalorder %s501_s18, %s501_s18 }
   0xc   :  { %p508_p6 = por %p507_p5, %p506_p4 }
   0xe   :  { %p509_p7 = pnand %p508_p6, %p502_p3 }
  0x10   :  { %512 = shalt.err (!%p509_p7)
}
  0x11   :  { %s586_s19 = smov 128   ;;  %s587_s20 = smov 8  }
  0x12   :  { %38 = dma.hbm_to_vmem [thread:$0]  %s757_s1, 512, %s33_s10, [#allocation6], %s586_s19, %s586_s19, %s587_s20  }
  0x13   :  { %s588_s23 = smov [#allocation2]   ;;  %s589_s25 = smov [#allocation7]  }
  0x14   :  { %s23_s24 = sshll.u32 %s588_s23, 4  ;;  %s50_s26 = sshll.u32 %s589_s25, 4  ;;  %s24_s24 = int_to_ptr.vmem [resolvable:$true] %s23_s24  ;;  %s51_s26 = int_to_ptr.vmem [resolvable:$true] %s50_s26 }
  0x15   :  { %s513_s29 = scalar_lea.hbm %s756_s0, 128 }
  0x16   :  { %p514_p8 = scmp.ne.s32.totalorder %s756_s0, %s513_s29  ;;  %p517_p9 = scmp.lt.u32.totalorder %s513_s29, %s756_s0 }
  0x18   :  { %p519_p10 = pnand %p517_p9, %p514_p8 }
  0x1a   :  { %522 = shalt.err (!%p519_p10)
}
  0x1b   :  { %s523_s1 = scalar_lea.vmem %s24_s24, 128  ;;  %p528_p12 = scmp.lt.s32.totalorder %s24_s24, %s24_s24 }
  0x1c   :  { %p524_p11 = scmp.ne.s32.totalorder %s24_s24, %s523_s1  ;;  %p529_p13 = scmp.lt.s32.totalorder %s523_s1, %s523_s1 }
  0x1e   :  { %p530_p0 = por %p529_p13, %p528_p12 }
  0x20   :  { %p531_p1 = pnand %p530_p0, %p524_p11 }
  0x22   :  { %534 = shalt.err (!%p531_p1)
}
  0x23   :  { %26 = dma.hbm_to_vmem [thread:$0]  %s756_s0, 128, %s24_s24, [#allocation3]  }
  0x24   :  { %s535_s17 = scalar_lea.hbm %s761_s5, 2048 }
  0x25   :  { %p536_p2 = scmp.ne.s32.totalorder %s761_s5, %s535_s17  ;;  %p539_p3 = scmp.lt.u32.totalorder %s535_s17, %s761_s5 }
  0x27   :  { %p541_p4 = pnand %p539_p3, %p536_p2 }
  0x29   :  { %544 = shalt.err (!%p541_p4)
}
  0x2a   :  { %s545_s25 = scalar_lea.vmem %s51_s26, 2048  ;;  %p550_p6 = scmp.lt.s32.totalorder %s51_s26, %s51_s26 }
  0x2b   :  { %p546_p5 = scmp.ne.s32.totalorder %s51_s26, %s545_s25  ;;  %p551_p7 = scmp.lt.s32.totalorder %s545_s25, %s545_s25 }
  0x2d   :  { %p552_p8 = por %p551_p7, %p550_p6 }
  0x2f   :  { %p553_p9 = pnand %p552_p8, %p546_p5 }
  0x31   :  { %556 = shalt.err (!%p553_p9)
}
  0x32   :  { %56 = dma.hbm_to_vmem [thread:$0]  %s761_s5, 2048, %s51_s26, [#allocation6], %s586_s19, %s586_s19, %s587_s20  }
  0x33   :  { %579 = dma.done.wait [#allocation3], 128  }
  0x34   :  { %580 = vsyncadd [#allocation3], 4294967168 }
  0x35   :  { %581 = dma.done.wait [#allocation6], 2560  }
  0x36   :  { %582 = vsyncadd [#allocation6], 4294964736  ;;  %v590_v0 = vmov 0.0|0.0   ;;  %vm591_vm0 = vmmov 0   ;;  %v592_v1 = vmov 0.0   ;;  %v73_v2 = vld [vmem:[#allocation5] sm:$0xff]  ;;  %v158_v9 = vlaneseq }
  0x37   :  { %440 = vmatprep.subr.bf16.mxu0 %v590_v0  ;;  %402 = vmatprep.mubr.msk.f32.mxu0 %vm591_vm0, %v592_v1  ;;  %v74_v3 = vld [vmem:[#allocation5 + $0x8] sm:$0xff]  ;;  %v75_v4 = vld [vmem:[#allocation5 + $0x10] sm:$0xff]  ;;  %v76_v6 = vld [vmem:[#allocation5 + $0x18] sm:$0xff]  ;;  %vm84_vm1 = vcmask 261120  }
  0x38   :  { %446 = vmatprep.subr.bf16.mxu1 %v590_v0  ;;  %437 = vmatprep.mubr.msk.f32.mxu1 %vm591_vm0, %v592_v1  ;;  %v441_v5 = vpack.c.bf16 %v74_v3, %v73_v2  ;;  %v444_v7 = vpack.c.bf16 %v76_v6, %v75_v4  ;;  %v72_v8 = vld [vmem:[#allocation2] sm:$0xff]  ;;  %v689_v10 = vand.u32 127, %v158_v9  ;;  %v192_v16 = vld [vmem:[#allocation7] sm:$0xff]  ;;  %v193_v17 = vld [vmem:[#allocation7 + $0x8] sm:$0xff] }
  0x39   :  { %v364_v11 = vld [vmem:[%s758_s2] ss:$0 sm:$0xff]  ;;  %v194_v18 = vld [vmem:[#allocation7 + $0x10] sm:$0xff]  ;;  %v447_v19 = vpack.c.bf16 %v193_v17, %v192_v16  ;;  %v196_v27 = vld [vmem:[#allocation7 + $0x20] sm:$0xff] }
  0x3a   :  { %442 = vmatpush3.bf16.msra.mxu0 %v441_v5  ;;  %vm160_vm2 = vcmp.lt.s32.totalorder %v689_v10, 64  ;;  %v195_v20 = vld [vmem:[#allocation7 + $0x18] sm:$0xff]  ;;  %v197_v28 = vld [vmem:[#allocation7 + $0x28] sm:$0xff]  ;;  %v198_v30 = vld [vmem:[#allocation7 + $0x30] sm:$0xff]  ;;  %vm286_vm3 = vcmp.ge.s32.totalorder %v689_v10, 16  ;;  %vm287_vm4 = vcmp.lt.s32.totalorder %v689_v10, 24 }
  0x3b   :  { %443 = vmatprep.subr.bf16.mxu0 %v590_v0  ;;  %448 = vmatpush3.bf16.msra.mxu1 %v447_v19  ;;  %v450_v21 = vpack.c.bf16 %v195_v20, %v194_v18  ;;  %v453_v29 = vpack.c.bf16 %v197_v28, %v196_v27  ;;  %v199_v31 = vld [vmem:[#allocation7 + $0x38] sm:$0xff]  ;;  %v200_v33 = vld [vmem:[#allocation7 + $0x40] sm:$0xff]  ;;  %v201_v34 = vld [vmem:[#allocation7 + $0x48] sm:$0xff]  ;;  %vm285_vm6 = vcmp.lt.s32.totalorder %v689_v10, 16 }
  0x3c   :  { %449 = vmatprep.subr.bf16.mxu1 %v590_v0  ;;  %v456_v32 = vpack.c.bf16 %v199_v31, %v198_v30  ;;  %v459_v35 = vpack.c.bf16 %v201_v34, %v200_v33  ;;  %v202_v36 = vld [vmem:[#allocation7 + $0x50] sm:$0xff]  ;;  %v203_v37 = vld [vmem:[#allocation7 + $0x58] sm:$0xff]  ;;  %v204_v39 = vld [vmem:[#allocation7 + $0x60] sm:$0xff] }
  0x3d   :  { %v462_v38 = vpack.c.bf16 %v203_v37, %v202_v36  ;;  %v205_v40 = vld [vmem:[#allocation7 + $0x68] sm:$0xff]  ;;  %v206_v42 = vld [vmem:[#allocation7 + $0x70] sm:$0xff]  ;;  %v207_v43 = vld [vmem:[#allocation7 + $0x78] sm:$0xff] }
  0x3e   :  { %445 = vmatpush3.bf16.msra.mxu0 %v444_v7  ;;  %v465_v41 = vpack.c.bf16 %v205_v40, %v204_v39  ;;  %v468_v44 = vpack.c.bf16 %v207_v43, %v206_v42  ;;  %v366_v49 = vld [vmem:[%s759_s3] ss:$0 sm:$0xff]  ;;  %vm719_vm5 = vmand %vm286_vm3, %vm287_vm4 }
  0x3f   :  { %451 = vmatpush3.bf16.msra.mxu1 %v450_v21  ;;  %v367_v51 = vld [vmem:[%s760_s4] ss:$0 sm:$0xff] }
  0x40   :  { %452 = vmatprep.subr.bf16.mxu1 %v590_v0  ;;  %v368_v55 = vld [vmem:[%s762_s6] ss:$0 sm:$0xff] }
  0x41   :  { %403 = vmatmul.mubr.msk.f32.vlgmr.msra.gmra.mrb[0].mxu0 %vm84_vm1, %v72_v8  ;;  %v370_v16 = vld [vmem:[%s763_s7] ss:$0 sm:$0xff]  ;;  %s593_s7 = smov [#allocation8]  }
  0x42   :  { %v371_v19 = vld [vmem:[%s764_s8] ss:$0 sm:$0xff]  ;;  %s354_s8 = sshll.u32 %s593_s7, 4  ;;  %s355_s8 = int_to_ptr.vmem [resolvable:$true] %s354_s8 }
  0x43   :  { %454 = vmatpush3.bf16.msra.mxu1 %v453_v29  ;;  %s557_s11 = scalar_lea.vmem %s355_s8, 128  ;;  %p562_p11 = scmp.lt.s32.totalorder %s355_s8, %s355_s8 }
  0x44   :  { %455 = vmatprep.subr.bf16.mxu1 %v590_v0  ;;  %p558_p10 = scmp.ne.s32.totalorder %s355_s8, %s557_s11  ;;  %p563_p12 = scmp.lt.s32.totalorder %s557_s11, %s557_s11 }
  0x46   :  { %p564_p13 = por %p563_p12, %p562_p11 }
  0x47   :  { %457 = vmatpush3.bf16.msra.mxu1 %v456_v32 }
  0x48   :  { %458 = vmatprep.subr.bf16.mxu1 %v590_v0  ;;  %p565_p0 = pnand %p564_p13, %p558_p10 }
  0x4b   :  { %460 = vmatpush3.bf16.msra.mxu1 %v459_v35 }
  0x4c   :  { %461 = vmatprep.subr.bf16.mxu1 %v590_v0 }
  0x4f   :  { %463 = vmatpush3.bf16.msra.mxu1 %v462_v38 }
  0x50   :  { %464 = vmatprep.subr.bf16.mxu1 %v590_v0 }
  0x53   :  { %466 = vmatpush3.bf16.msra.mxu1 %v465_v41 }
  0x54   :  { %467 = vmatprep.subr.bf16.mxu1 %v590_v0 }
  0x57   :  { %469 = vmatpush3.bf16.msra.mxu1 %v468_v44 }
 0x114   :  { %v154_v12 = vpop.f32.mrb[0].mxu0 }
 0x115   :  { %v155_v13 = vadd.f32 %v364_v11, %v154_v12  ;;  %v404_v14 = vpop.f32.mrb[1].mxu0 }
 0x117   :  { %v161_v15 = vsel %vm160_vm2, %v155_v13, 0.0 }
 0x118   :  { %162 = vadd.xlane.f32.xlu0 %v161_v15 }
 0x1a5   :  { %v163_v22 = vpop.xlane.xlu0 %162 }
 0x1a6   :  { %v164_v23 = vmul.f32 0.015625, %v163_v22 }
 0x1a8   :  { %v165_v24 = vsub.f32 %v155_v13, %v164_v23 }
 0x1aa   :  { %v166_v25 = vsel %vm160_vm2, %v165_v24, 0.0 }
 0x1ab   :  { %v167_v26 = vmul.f32 %v166_v25, %v166_v25 }
 0x1ad   :  { %168 = vadd.xlane.f32.xlu0 %v167_v26 }
 0x23a   :  { %v169_v45 = vpop.xlane.xlu0 %168 }
 0x23b   :  { %v170_v46 = vmul.f32 0.015625, %v169_v45 }
 0x23d   :  { %v171_v47 = vadd.f32 1e-05, %v170_v46 }
 0x23f   :  { %479 = vrsqrt.f32 %v171_v47 }
 0x249   :  { %v480_v48 = vpop.eup %479 }
 0x24a   :  { %v173_v50 = vmul.f32 %v480_v48, %v166_v25 }
 0x24c   :  { %v181_v52 = vmul.f32 %v366_v49, %v173_v50 }
 0x24e   :  { %v189_v53 = vadd.f32 %v367_v51, %v181_v52 }
 0x250   :  { %v190_v54 = vmax.f32 %v189_v53, 0.0 }
 0x252   :  { %438 = vmatmul.mubr.msk.f32.vlgmr.msra.gmra.mrb[0].mxu1 %vm160_vm2, %v190_v54 }
 0x325   :  { %v281_v56 = vpop.f32.mrb[0].mxu1 }
 0x326   :  { %v282_v58 = vadd.f32 %v368_v55, %v281_v56  ;;  %v439_v59 = vpop.f32.mrb[1].mxu1 }
 0x328   :  { %v329_v60 = vsel %vm719_vm5, %v282_v58, 0.0  ;;  %v291_v61 = vsel %vm285_vm6, %v282_v58, 0.0 }
 0x329   :  { %330 = vadd.xlane.f32.xlu0 %v329_v60  ;;  %292 = vadd.xlane.f32.xlu1 %v291_v61 }
 0x3b6   :  { %v331_v62 = vpop.xlane.xlu0 %330  ;;  %v293_v63 = vpop.xlane.xlu1 %292 }
 0x3b7   :  { %v332_v0 = vmul.f32 0.125, %v331_v62  ;;  %v294_v1 = vmul.f32 0.0625, %v293_v63 }
 0x3b9   :  { %v333_v2 = vsub.f32 %v282_v58, %v332_v0  ;;  %v295_v3 = vsub.f32 %v282_v58, %v294_v1 }
 0x3bb   :  { %v334_v4 = vsel %vm719_vm5, %v333_v2, 0.0  ;;  %v296_v5 = vsel %vm285_vm6, %v295_v3, 0.0 }
 0x3bc   :  { %v335_v6 = vmul.f32 %v334_v4, %v334_v4  ;;  %v297_v7 = vmul.f32 %v296_v5, %v296_v5 }
 0x3be   :  { %336 = vadd.xlane.f32.xlu0 %v335_v6  ;;  %298 = vadd.xlane.f32.xlu1 %v297_v7 }
 0x44b   :  { %v337_v8 = vpop.xlane.xlu0 %336  ;;  %v299_v9 = vpop.xlane.xlu1 %298 }
 0x44c   :  { %v338_v11 = vmul.f32 0.125, %v337_v8  ;;  %v300_v12 = vmul.f32 0.0625, %v299_v9 }
 0x44e   :  { %v339_v13 = vadd.f32 1e-05, %v338_v11  ;;  %v301_v14 = vadd.f32 1e-05, %v300_v12 }
 0x450   :  { %481 = vrsqrt.f32 %v339_v13 }
 0x451   :  { %483 = vrsqrt.f32 %v301_v14 }
 0x45a   :  { %v482_v15 = vpop.eup %481 }
 0x45b   :  { %v484_v17 = vpop.eup %483  ;;  %v341_v18 = vmul.f32 %v482_v15, %v334_v4 }
 0x45c   :  { %v303_v20 = vmul.f32 %v484_v17, %v296_v5 }
 0x45d   :  { %v342_v21 = vmul.f32 %v370_v16, %v341_v18 }
 0x45e   :  { %v310_v22 = vmul.f32 %v370_v16, %v303_v20 }
 0x45f   :  { %v343_v23 = vadd.f32 %v371_v19, %v342_v21 }
 0x460   :  { %v317_v24 = vadd.f32 %v371_v19, %v310_v22 }
 0x462   :  { %v318_v25 = vsel %vm285_vm6, %v317_v24, -inf }
 0x463   :  { %319 = vmax.xlane.f32.xlu1 %v318_v25 }
 0x4f0   :  { %v320_v26 = vpop.xlane.xlu1 %319 }
 0x4f1   :  { %v321_v27 = vsub.f32 %v317_v24, %v320_v26 }
 0x4f3   :  { %v322_v28 = vmul.f32 1.442695, %v321_v27 }
 0x4f5   :  { %485 = vpow2.f32 %v322_v28 }
 0x4f6   :  { %487 = vtanh.f32 %v343_v23 }
 0x4ff   :  { %v486_v29 = vpop.eup %485 }
 0x500   :  { %v324_v30 = vsel %vm285_vm6, %v486_v29, 0.0  ;;  %v488_v32 = vpop.eup %487 }
 0x501   :  { %325 = vadd.xlane.f32.xlu1 %v324_v30  ;;  %v345_v35 = vsel %vm719_vm5, %v488_v32, 0.0 }
 0x58e   :  { %v326_v31 = vpop.xlane.xlu1 %325 }
 0x58f   :  { %489 = vrcp.f32 %v326_v31 }
 0x599   :  { %v490_v33 = vpop.eup %489 }
 0x59a   :  { %v328_v34 = vmul.f32 %v490_v33, %v324_v30 }
 0x59c   :  { %v346_v36 = vadd.f32 %v345_v35, %v328_v34 }
 0x59e   :  { %347 = vst [vmem:[#allocation8] sm:$0xff] %v346_v36 }
 0x59f   :  { %568 = shalt.err (!%p565_p0)
}
 0x5a0   :  { %s569_s1 = scalar_lea.hbm %s765_s9, 128 }
 0x5a1   :  { %p570_p1 = scmp.ne.s32.totalorder %s765_s9, %s569_s1  ;;  %p573_p2 = scmp.lt.u32.totalorder %s569_s1, %s765_s9 }
 0x5a3   :  { %p575_p3 = pnand %p573_p2, %p570_p1 }
 0x5a5   :  { %578 = shalt.err (!%p575_p3)
}
 0x5a6   :  { %357 = dma.vmem_to_hbm [thread:$0]  %s355_s8, 128, %s765_s9, [#allocation4]  }
 0x5a7   :  { %583 = dma.done.wait [#allocation4], 128  }
 0x5a8   :  { %584 = vsyncadd [#allocation4], 4294967168 }
 0x5a9   :  { %361 = vsyncpa [#allocation3], 1 }
 0x5aa   :  { %362 = vsyncpa [#allocation6], 1 }
 0x5ab   :  { %363 = vsyncpa [#allocation4], 1 }

</bundles_post_ra>
